<compile_context>
chip_gen: v5e
topology: v5e:2x2
jax: 0.10.0
libtpu: 0.0.40
codegen_flags: <defaults>
</compile_context>

<pallas_src>
import jax
import jax.numpy as jnp
from jax.experimental import pallas as pl
from jax.experimental.pallas import tpu as pltpu


LANE = 128                      # lane width: pad feature dims to multiples of this
VMEM_LIMIT = 32 * 1024 * 1024   # scoped VMEM limit (footprint ~6 MiB at 1024 tiles)
_NEG_INF = -1e30


def _round_up(x, m):
    return (x + m - 1) // m * m


def _pad2(a, rows, cols, value=0.0):
    return jnp.pad(a, ((0, rows - a.shape[0]), (0, cols - a.shape[1])),
                   constant_values=value)


def _choose_adj_tile(n):
    """Square tile for the N x N adjacency.  As big as sensible (fewer grid steps,
    less redundant H re-read), but keep >= 2 row tiles whenever the graph allows so
    the 'parallel' row axis can shard across both TensorCores on v7x."""
    tile = 1024
    while tile > 256 and _round_up(n, tile) < 2 * tile:
        tile //= 2
    return tile


def _choose_feat_tile(f_pad):
    """Largest contraction tile (<=512) that divides the padded feature dim."""
    for t in (512, 256, 128):
        if f_pad % t == 0:
            return t
    return f_pad


# ----------------------------------------------------------------------------
# Kernel 1: fc1 linear  H1 = X @ W1 + b1
#   grid (row tile, feature-contraction tile); bf16 operands, f32 accumulator.
# ----------------------------------------------------------------------------
def _linear_kernel(x_ref, w_ref, b_ref, h_ref, acc_ref):
    k = pl.program_id(1)

    @pl.when(k == 0)
    def _():
        acc_ref[...] = jnp.zeros_like(acc_ref)

    acc_ref[...] += jnp.dot(x_ref[...], w_ref[...],
                            preferred_element_type=jnp.float32)

    @pl.when(k == pl.num_programs(1) - 1)
    def _():
        h_ref[...] = (acc_ref[...] + b_ref[...]).astype(h_ref.dtype)


def _linear(x, w, b, *, tm, tk, out_dtype=jnp.bfloat16):
    n_rows, fin = x.shape
    fout = w.shape[1]
    grid = (n_rows // tm, fin // tk)
    return pl.pallas_call(
        _linear_kernel,
        out_shape=jax.ShapeDtypeStruct((n_rows, fout), out_dtype),
        grid_spec=pltpu.PrefetchScalarGridSpec(
            num_scalar_prefetch=0,
            grid=grid,
            in_specs=[
                pl.BlockSpec((tm, tk), lambda i, k: (i, k)),
                pl.BlockSpec((tk, fout), lambda i, k: (k, 0)),
                pl.BlockSpec((1, fout), lambda i, k: (0, 0)),
            ],
            out_specs=pl.BlockSpec((tm, fout), lambda i, k: (i, 0)),
            scratch_shapes=[pltpu.VMEM((tm, fout), jnp.float32)],
        ),
        compiler_params=pltpu.CompilerParams(
            dimension_semantics=("parallel", "arbitrary"),
            vmem_limit_bytes=VMEM_LIMIT,
        ),
        cost_estimate=pl.CostEstimate(
            flops=2 * n_rows * fin * fout,
            transcendentals=0,
            bytes_accessed=int(n_rows * fin * 2                      # X stream (bf16)
                               + (n_rows // tm) * fin * fout * 2     # W re-read / row tile
                               + fout * 4                            # bias
                               + n_rows * fout * 2),                 # H1 out (bf16)
        ),
    )(x, w, b)


# ----------------------------------------------------------------------------
# Kernel 2: first aggregation with fused fc2:
#   H2 = relu(adj @ H1) @ W2 + b2   (Z_0 never materializes in HBM)
#   grid (row tile, K tile); f32 accumulator, fc2 epilogue in last-K pl.when.
# ----------------------------------------------------------------------------
def _agg_fc2_kernel(adj_ref, h1_ref, w2_ref, b2_ref, h2_ref, acc_ref):
    k = pl.program_id(1)

    @pl.when(k == 0)
    def _():
        acc_ref[...] = jnp.zeros_like(acc_ref)

    acc_ref[...] += jnp.dot(adj_ref[...], h1_ref[...],
                            preferred_element_type=jnp.float32)

    @pl.when(k == pl.num_programs(1) - 1)
    def _():
        z0 = jnp.maximum(acc_ref[...], 0.0)   # Z_0 = relu(adj @ fc1(x)); dropout == identity (eval)
        h2 = jnp.dot(z0, w2_ref[...],
                     preferred_element_type=jnp.float32) + b2_ref[...]
        h2_ref[...] = h2.astype(h2_ref.dtype)


def _aggregate_relu_fc2(adj, h1, w2, b2, *, tile, out_dtype=jnp.bfloat16):
    n_rows = adj.shape[0]
    hid_in = h1.shape[1]
    hid_out = w2.shape[1]
    grid = (n_rows // tile, n_rows // tile)
    return pl.pallas_call(
        _agg_fc2_kernel,
        out_shape=jax.ShapeDtypeStruct((n_rows, hid_out), out_dtype),
        grid_spec=pltpu.PrefetchScalarGridSpec(
            num_scalar_prefetch=0,
            grid=grid,
            in_specs=[
                pl.BlockSpec((tile, tile), lambda i, k: (i, k)),
                pl.BlockSpec((tile, hid_in), lambda i, k: (k, 0)),
                pl.BlockSpec((hid_in, hid_out), lambda i, k: (0, 0)),
                pl.BlockSpec((1, hid_out), lambda i, k: (0, 0)),
            ],
            out_specs=pl.BlockSpec((tile, hid_out), lambda i, k: (i, 0)),
            scratch_shapes=[pltpu.VMEM((tile, hid_in), jnp.float32)],
        ),
        compiler_params=pltpu.CompilerParams(
            dimension_semantics=("parallel", "arbitrary"),
            vmem_limit_bytes=VMEM_LIMIT,
        ),
        cost_estimate=pl.CostEstimate(
            flops=2 * n_rows * n_rows * hid_in + 2 * n_rows * hid_in * hid_out,
            transcendentals=0,
            bytes_accessed=int(n_rows * n_rows * 2                         # adj (bf16)
                               + (n_rows // tile) * n_rows * hid_in * 2    # H1 re-read / row tile
                               + hid_in * hid_out * 4 + hid_out * 4        # W2, b2
                               + n_rows * hid_out * 2),                    # H2 out (bf16)
        ),
    )(adj, h1, w2, b2)


# ----------------------------------------------------------------------------
# Kernel 3: second aggregation with fused fc3 + log_softmax epilogue:
#   Z_1 = relu(adj @ H2);  logp = log_softmax(Z_1 @ W3 + b3)
# ----------------------------------------------------------------------------
def _agg_out_kernel(adj_ref, h_ref, w3_ref, b3_ref, logp_ref, z1_ref, acc_ref):
    k = pl.program_id(1)

    @pl.when(k == 0)
    def _():
        acc_ref[...] = jnp.zeros_like(acc_ref)

    acc_ref[...] += jnp.dot(adj_ref[...], h_ref[...],
                            preferred_element_type=jnp.float32)

    @pl.when(k == pl.num_programs(1) - 1)
    def _():
        z1 = jnp.maximum(acc_ref[...], 0.0)
        logits = jnp.dot(z1, w3_ref[...],
                         preferred_element_type=jnp.float32) + b3_ref[...]
        # padded class lanes have bias = -1e30 -> exp() == 0, softmax unaffected
        m = jnp.max(logits, axis=1, keepdims=True)
        lse = jnp.log(jnp.sum(jnp.exp(logits - m), axis=1, keepdims=True)) + m
        logp_ref[...] = (logits - lse).astype(logp_ref.dtype)
        z1_ref[...] = z1.astype(z1_ref.dtype)


def _aggregate_relu_fc3_lsm(adj, h, w3, b3, *, tile):
    n_rows = adj.shape[0]
    hid = h.shape[1]
    n_cls = w3.shape[1]
    grid = (n_rows // tile, n_rows // tile)
    return pl.pallas_call(
        _agg_out_kernel,
        out_shape=(
            jax.ShapeDtypeStruct((n_rows, n_cls), jnp.float32),   # log_softmax
            jax.ShapeDtypeStruct((n_rows, hid), jnp.float32),     # Z_1
        ),
        grid_spec=pltpu.PrefetchScalarGridSpec(
            num_scalar_prefetch=0,
            grid=grid,
            in_specs=[
                pl.BlockSpec((tile, tile), lambda i, k: (i, k)),
                pl.BlockSpec((tile, hid), lambda i, k: (k, 0)),
                pl.BlockSpec((hid, n_cls), lambda i, k: (0, 0)),
                pl.BlockSpec((1, n_cls), lambda i, k: (0, 0)),
            ],
            out_specs=(
                pl.BlockSpec((tile, n_cls), lambda i, k: (i, 0)),
                pl.BlockSpec((tile, hid), lambda i, k: (i, 0)),
            ),
            scratch_shapes=[pltpu.VMEM((tile, hid), jnp.float32)],
        ),
        compiler_params=pltpu.CompilerParams(
            dimension_semantics=("parallel", "arbitrary"),
            vmem_limit_bytes=VMEM_LIMIT,
        ),
        cost_estimate=pl.CostEstimate(
            flops=2 * n_rows * n_rows * hid + 2 * n_rows * hid * n_cls,
            transcendentals=int(n_rows * n_cls + n_rows),
            bytes_accessed=int(n_rows * n_rows * 2                        # adj (bf16)
                               + (n_rows // tile) * n_rows * hid * 2      # H2 re-read / row tile
                               + hid * n_cls * 4 + n_cls * 4              # W3, b3
                               + n_rows * (n_cls + hid) * 4),             # f32 outputs
        ),
    )(adj, h, w3, b3)


# ----------------------------------------------------------------------------
# Forward pass
# ----------------------------------------------------------------------------
def gnn_forward(x_in, adj, params):
    """params = (w1, b1, w2, b2, w3, b3); wK are (in_dim, out_dim), bK are (1, out_dim)."""
    w1, b1, w2, b2, w3, b3 = params
    N, n_feat = x_in.shape
    n_h1, n_h2, n_class = w1.shape[1], w2.shape[1], w3.shape[1]

    # Tile choices + lane-dense padded problem sizes.
    tile = _choose_adj_tile(N)                 # TM == TK -> single tile, trivial lcm
    n_pad = _round_up(N, tile)
    f_pad = _round_up(n_feat, LANE)
    tkf = _choose_feat_tile(f_pad)
    h1_pad = _round_up(n_h1, LANE)
    h2_pad = _round_up(n_h2, LANE)
    c_pad = _round_up(n_class, LANE)

    # bf16 for the big HBM streams (x, W1, adj, H1, H2); f32 accumulation everywhere,
    # f32 for the small resident epilogue weights (W2, W3) and biases.
    xp = _pad2(x_in, n_pad, f_pad).astype(jnp.bfloat16)
    adjp = _pad2(adj, n_pad, n_pad).astype(jnp.bfloat16)

    w1p = _pad2(w1, f_pad, h1_pad).astype(jnp.bfloat16)
    b1p = _pad2(b1, 1, h1_pad)
    w2p = _pad2(w2, h1_pad, h2_pad)
    b2p = _pad2(b2, 1, h2_pad)
    w3p = _pad2(w3, h2_pad, c_pad)
    b3p = _pad2(b3, 1, c_pad, value=_NEG_INF)   # kill padded class lanes in softmax

    # Layer 1 linear: H1 = x @ W1 + b1
    h1 = _linear(xp, w1p, b1p, tm=tile, tk=tkf)                  # (n_pad, h1_pad) bf16
    # Aggregation 1 with fused fc2: H2 = relu(adj @ H1) @ W2 + b2 (Z_0 stays in VMEM)
    h2 = _aggregate_relu_fc2(adjp, h1, w2p, b2p, tile=tile)      # (n_pad, h2_pad) bf16
    # Aggregation 2 with fused fc3 + log_softmax
    logp_p, z1_p = _aggregate_relu_fc3_lsm(adjp, h2, w3p, b3p, tile=tile)

    return logp_p[:N, :n_class], z1_p[:N, :n_h2]


def gnn_reference(x_in, adj, params):
    """Pure-JAX f32 reference (matches the PyTorch forward)."""
    w1, b1, w2, b2, w3, b3 = params
    z0 = jnp.maximum(adj @ (x_in @ w1 + b1), 0.0)
    z1 = jnp.maximum(adj @ (z0 @ w2 + b2), 0.0)
    logits = z1 @ w3 + b3
    return jax.nn.log_softmax(logits, axis=1), z1


def init_params(key, n_feat, n_hidden_1, n_hidden_2, n_class):
    """Deterministic nn.Linear-style init; weights stored as (in_dim, out_dim)."""
    ks = jax.random.split(key, 6)

    def linear(kw, kb, fan_in, fan_out):
        bound = 1.0 / jnp.sqrt(fan_in)
        w = jax.random.uniform(kw, (fan_in, fan_out), jnp.float32, -bound, bound)
        b = jax.random.uniform(kb, (1, fan_out), jnp.float32, -bound, bound)
        return w, b

    w1, b1 = linear(ks[0], ks[1], n_feat, n_hidden_1)
    w2, b2 = linear(ks[2], ks[3], n_hidden_1, n_hidden_2)
    w3, b3 = linear(ks[4], ks[5], n_hidden_2, n_class)
    return (w1, b1, w2, b2, w3, b3)


if __name__ == "__main__":
    # Small deterministic example that still exercises padding and a multi-tile
    # (2 x 2) adjacency grid plus a tiled feature contraction in the linear.
    N, n_feat, n_hidden_1, n_hidden_2, n_class = 1000, 300, 64, 32, 7

    key = jax.random.PRNGKey(0)
    k_x, k_adj, k_params = jax.random.split(key, 3)

    x_in = jax.random.normal(k_x, (N, n_feat), dtype=jnp.float32)

    # Symmetric row-normalized adjacency with self loops (dense, deterministic).
    a = (jax.random.uniform(k_adj, (N, N)) < 0.1).astype(jnp.float32)
    a = jnp.maximum(a, a.T) + jnp.eye(N, dtype=jnp.float32)
    deg = jnp.sum(a, axis=1, keepdims=True)
    adj = a / deg

    params = init_params(k_params, n_feat, n_hidden_1, n_hidden_2, n_class)

    log_probs, z1 = gnn_forward(x_in, adj, params)
    jax.block_until_ready((log_probs, z1))

    # Sanity 1: shapes and log_softmax rows exponentiate-sum to ~1.
    assert log_probs.shape == (N, n_class)
    assert z1.shape == (N, n_hidden_2)
    row_sums = jnp.sum(jnp.exp(log_probs), axis=1)
    assert bool(jnp.all(jnp.abs(row_sums - 1.0) < 1e-4))

    # Sanity 2: match the f32 reference (bf16 adjacency/activation streams => loose tol).
    logp_ref, z1_ref = gnn_reference(x_in, adj, params)
    assert float(jnp.max(jnp.abs(log_probs - logp_ref))) < 5e-2
    assert float(jnp.max(jnp.abs(z1 - z1_ref))) < 5e-2

    print("KERNEL_OK")
</pallas_src>

<mosaic_0001>
module attributes {stable_mosaic.version = 11 : i64} {
  func.func @_linear_kernel(%arg0: i32, %arg1: i32, %arg2: memref<512x128xbf16, #tpu.memory_space<vmem>>, %arg3: memref<128x128xbf16, #tpu.memory_space<vmem>>, %arg4: memref<1x128xf32, #tpu.memory_space<vmem>>, %arg5: memref<512x128xbf16, #tpu.memory_space<vmem>>, %arg6: memref<512x128xf32, #tpu.memory_space<vmem>>) attributes {dimension_semantics = [#tpu.dimension_semantics<parallel>, #tpu.dimension_semantics<arbitrary>], iteration_bounds = array<i64: 2, 3>, scalar_prefetch = 0 : i64, scratch_operands = 1 : i64, tpu.core_type = #tpu.core_type<tc>, window_params = [{transform_indices = @transform_0, window_bounds = array<i64: 512, 128>}, {transform_indices = @transform_1, window_bounds = array<i64: 128, 128>}, {pipeline_mode = #tpu.pipeline_mode<synchronous>, transform_indices = @transform_2, window_bounds = array<i64: 1, 128>}, {transform_indices = @transform_3, window_bounds = array<i64: 512, 128>}]} {
    %c0_i32 = arith.constant 0 : i32
    %0 = arith.cmpi eq, %arg1, %c0_i32 : i32
    %1 = arith.extui %0 : i1 to i32
    %c0_i32_0 = arith.constant 0 : i32
    %2 = arith.cmpi ne, %1, %c0_i32_0 : i32
    scf.if %2 {
      %cst_9 = arith.constant 0.000000e+00 : f32
      %12 = vector.broadcast %cst_9 : f32 to vector<512x128xf32>
      %c0_10 = arith.constant 0 : index
      %c0_11 = arith.constant 0 : index
      %13 = vector.load %arg6[%c0_10, %c0_11] : memref<512x128xf32, #tpu.memory_space<vmem>>, vector<512x128xf32>
      tpu.vector_store %arg6[%c0_10, %c0_11], %12 {strides = array<i32>} : memref<512x128xf32, #tpu.memory_space<vmem>>, vector<512x128xf32>,
    } else {
    }
    %c0 = arith.constant 0 : index
    %c0_1 = arith.constant 0 : index
    %3 = vector.load %arg6[%c0, %c0_1] : memref<512x128xf32, #tpu.memory_space<vmem>>, vector<512x128xf32>
    %c0_2 = arith.constant 0 : index
    %c0_3 = arith.constant 0 : index
    %4 = vector.load %arg2[%c0_2, %c0_3] : memref<512x128xbf16, #tpu.memory_space<vmem>>, vector<512x128xbf16>
    %c0_4 = arith.constant 0 : index
    %c0_5 = arith.constant 0 : index
    %5 = vector.load %arg3[%c0_4, %c0_5] : memref<128x128xbf16, #tpu.memory_space<vmem>>, vector<128x128xbf16>
    %cst = arith.constant dense<0.000000e+00> : vector<512x128xf32>
    %6 = tpu.matmul %4, %5, %cst {dimension_numbers = #tpu.dot_dimension_numbers<[1], [0], [0], [1], [0, 0, 1, 1], [], []>} : vector<512x128xbf16>, vector<128x128xbf16>, vector<512x128xf32> -> vector<512x128xf32>
    %7 = arith.addf %3, %6 : vector<512x128xf32>
    %c0_6 = arith.constant 0 : index
    %c0_7 = arith.constant 0 : index
    %8 = vector.load %arg6[%c0_6, %c0_7] : memref<512x128xf32, #tpu.memory_space<vmem>>, vector<512x128xf32>
    tpu.vector_store %arg6[%c0_6, %c0_7], %7 {strides = array<i32>} : memref<512x128xf32, #tpu.memory_space<vmem>>, vector<512x128xf32>,
    %c2_i32 = arith.constant 2 : i32
    %9 = arith.cmpi eq, %arg1, %c2_i32 : i32
    %10 = arith.extui %9 : i1 to i32
    %c0_i32_8 = arith.constant 0 : i32
    %11 = arith.cmpi ne, %10, %c0_i32_8 : i32
    scf.if %11 {
      %c0_9 = arith.constant 0 : index
      %c0_10 = arith.constant 0 : index
      %12 = vector.load %arg6[%c0_9, %c0_10] : memref<512x128xf32, #tpu.memory_space<vmem>>, vector<512x128xf32>
      %c0_11 = arith.constant 0 : index
      %c0_12 = arith.constant 0 : index
      %13 = vector.load %arg4[%c0_11, %c0_12] : memref<1x128xf32, #tpu.memory_space<vmem>>, vector<1x128xf32>
      %14 = vector.broadcast %13 : vector<1x128xf32> to vector<512x128xf32>
      %15 = arith.addf %12, %14 : vector<512x128xf32>
      %16 = arith.truncf %15 : vector<512x128xf32> to vector<512x128xbf16>
      %c0_13 = arith.constant 0 : index
      %c0_14 = arith.constant 0 : index
      %17 = vector.load %arg5[%c0_13, %c0_14] : memref<512x128xbf16, #tpu.memory_space<vmem>>, vector<512x128xbf16>
      tpu.vector_store %arg5[%c0_13, %c0_14], %16 {strides = array<i32>} : memref<512x128xbf16, #tpu.memory_space<vmem>>, vector<512x128xbf16>,
    } else {
    }
    return
  }
  func.func @transform_0(%arg0: i32, %arg1: i32) -> (i32, i32) {
    %c0_i32 = arith.constant 0 : i32
    return %arg0, %arg1 : i32, i32
  }
  func.func @transform_1(%arg0: i32, %arg1: i32) -> (i32, i32) {
    %c0_i32 = arith.constant 0 : i32
    %c0_i32_0 = arith.constant 0 : i32
    return %arg1, %c0_i32 : i32, i32
  }
  func.func @transform_2(%arg0: i32, %arg1: i32) -> (i32, i32) {
    %c0_i32 = arith.constant 0 : i32
    %c0_i32_0 = arith.constant 0 : i32
    %c0_i32_1 = arith.constant 0 : i32
    return %c0_i32, %c0_i32_0 : i32, i32
  }
  func.func @transform_3(%arg0: i32, %arg1: i32) -> (i32, i32) {
    %c0_i32 = arith.constant 0 : i32
    %c0_i32_0 = arith.constant 0 : i32
    return %arg0, %c0_i32 : i32, i32
  }
}

</mosaic_0001>

<bundles_post_ra>
// kernel: tpu_custom_call.1
= control target key start
LH: loop header
LB: loop body
LE: loop exit
PB: predicated region body
PF: predicated region fallthrough
CT: control target
= control target key end

     0   :  { %s2685_s0 = inlined_call_operand.hbm [shape: bf16[1024,384], index: 0, kind: input, shape index: {}]   ;;  %s2686_s1 = inlined_call_operand.hbm [shape: bf16[384,128], index: 1, kind: input, shape index: {}]   ;;  %s2687_s2 = inlined_call_operand.vmem [shape: f32[1,128], index: 2, kind: input, shape index: {}]   ;;  %s2688_s3 = inlined_call_operand.hbm [shape: bf16[1024,128], index: 3, kind: output, shape index: {}]  }
   0x1   :  { %2698 = sst [smem:[#allocation18_spill]] %s2685_s0 }
   0x2   :  { %2699 = sst [smem:[#allocation19_spill]] %s2688_s3 }
   0x3   :  { %8 = vsyncpa [#allocation4], 0 }
   0x4   :  { %10 = vsyncpa [#allocation4 + $0x1], 0 }
   0x5   :  { %11 = vsyncpa [#allocation7], 0 }
   0x6   :  { %13 = vsyncpa [#allocation7 + $0x1], 0 }
   0x7   :  { %14 = vsyncpa [#allocation5], 0 }
   0x8   :  { %16 = vsyncpa [#allocation5 + $0x1], 0  ;;  %s2206_s12 = smov 0   ;;  %s2208_s13 = smov 0  }
   0x9   :  { %s2210_s14 = smov 0   ;;  %s2212_s15 = smov 0  }
   0xa   :  { %s2214_s16 = smov 0   ;;  %s2216_s17 = smov 0  }
   0xb   :  { %s2218_s18 = smov 0   ;;  %s2220_s19 = smov 0  }
   0xc   :  { %s2222_s20 = smov 0   ;;  %s2224_s21 = smov 0  }
   0xd   :  { %s2226_s22 = smov 0   ;;  %s2228_s23 = smov 0  }
   0xe   :  { %s2230_s24 = smov 0   ;;  %s2232_s25 = smov 0  }
   0xf LB: > { %2700 = sst [smem:[#allocation12_spill]] %s2158_s20  ;;  %s31_s26 = sadd.s32 1, %s2170_s23  ;;  %s2178_s25 = sphi %s2232_s25, %s22_s25   ;;  %s2174_s24 = sphi %s2230_s24, %s2725_s24   ;;  %s2170_s23 = sphi %s2228_s23, %s2724_s23   ;;  %s2166_s22 = sphi %s2226_s22, %s2723_s22   ;;  %s2162_s21 = sphi %s2224_s21, %s2722_s21   ;;  %s2158_s20 = sphi %s2222_s20, %s2721_s20   ;;  %s2154_s19 = sphi %s2220_s19, %s2734_s19   ;;  %s2150_s18 = sphi %s2218_s18, %s2733_s18   ;;  %s2146_s17 = sphi %s2216_s17, %s2732_s17   ;;  %s2142_s16 = sphi %s2214_s16, %s2731_s16   ;;  %s2138_s15 = sphi %s2212_s15, %s2730_s15   ;;  %s2134_s14 = sphi %s2210_s14, %s2729_s14   ;;  %s2130_s13 = sphi %s2208_s13, %s2728_s13   ;;  %s2126_s12 = sphi %s2206_s12, %s2727_s12  }
  0x10   : > { %2701 = sst [smem:[#allocation13_spill]] %s2170_s23  ;;  %s34_s27 = sadd.s32 1, %s2174_s24 }
  0x11   : > { %2702 = sst [smem:[#allocation14_spill]] %s2174_s24  ;;  %p32_p0 = scmp.ge.s32.totalorder %s31_s26, 3 }
  0x12   : > { %s43_s28 = sadd.s32 1, %s2158_s20  ;;  %p50_p1 = scmp.ne.s32.totalorder %s2158_s20, %s2154_s19 }
  0x13   : > { %p51_p2 = scmp.eq.s32.totalorder %s2178_s25, 0  ;;  %s2736_s26 = smov (%p32_p0, %s31_s26), 0 }
  0x14   : > { %2703 = sst [smem:[#allocation15_spill]] %s2736_s26  ;;  %s2738_s27 = smov (!%p32_p0, %s34_s27), %s2174_s24 }
  0x15   : > { %s2287_s29 = ssub.s32 %s2170_s23, %s2736_s26  ;;  %p2291_p3 = por %p51_p2, %p50_p1 }
  0x16   : > { %p36_p4 = scmp.ge.s32.totalorder %s2738_s27, 2  ;;  %p56_p5 = scmp.ne.s32.totalorder %s2154_s19, %s2150_s18 }
  0x17   : > { %p67_p6 = scmp.eq.s32.totalorder %s2287_s29, 0  ;;  %s116_s4 = sadd.s32 1, %s2134_s14 }
  0x18   : > { %s2740_s27 = smov (%p36_p4, %s2738_s27), 0  ;;  %p2693_p7 = scmp.lt.s32.totalorder %s2178_s25, 6 }
  0x19   : > { %2705 = sst [smem:[#allocation16_spill]] %s2740_s27  ;;  %s38_s5 = ssub.s32 %s2174_s24, %s2740_s27 }
  0x1a   : > { %s156_s6 = sand.u32 1, %s2158_s20   ;;  %s40_s7 = sor.u32 %s2287_s29, %s38_s5 }
  0x1b   : > { %p114_p8 = scmp.eq.s32.totalorder %s38_s5, 0  ;;  %p41_p9 = scmp.eq.s32.totalorder %s40_s7, 0 }
  0x1c   : > { %s1394_s10 = sshll.u32 %s156_s6, 8  ;;  %s1829_s11 = smul.u32 192, %s2174_s24 }
  0x1d   : > { %s2307_s8 = scalar_select %p114_p8, %s2134_s14, %s116_s4  }
  0x1e   : > { %s2310_s9 = scalar_select %p41_p9, %s2158_s20, %s43_s28  }
  0x1f   : > { %p2317_p10 = pnand %p2693_p7, %p2291_p3  ;;  %s165_s27 = sadd.s32 %s2170_s23, %s1829_s11 }
  0x20   : > { %2706 = sst [smem:[#allocation17_spill]] %s2310_s9  ;;  %s160_s3 = scalar_lea.vmem [#allocation3], %s1394_s10 }
  0x21   : > { %s170_s5 = sshll.u32 %s160_s3, 4  ;;  %s1397_s7 = sshll.u32 %s165_s27, 2  ;;  %s171_s5 = int_to_ptr.vmem [resolvable:$true] %s170_s5 }
  0x22   : > { %s2708_s0 = sld [smem:[#allocation18_spill]]  ;;  %p1401_p11 = scmp.ge.s32.totalorder %s2178_s25, 1 }
  0x23   : > { %s157_s3 = scalar_lea.sflag [#allocation4], %s156_s6  ;;  %s2180_s27 = smov 192  }
  0x24   : > { %s2694_s10 = smov 64   ;;  %s2695_s11 = smov 4  }
  0x25   : > { %p200_p12 = scmp.lt.s32.totalorder %s2178_s25, 7  ;;  %s1390_s28 = sadd.s32 4294967295, %s2178_s25  }
  0x26   : > { %s1391_s4 = sadd.s32 4294967294, %s2178_s25   ;;  %p57_p0 = scmp.eq.s32.totalorder %s1390_s28, 0 }
  0x27   : > { %p2331_p13 = pnand %p1401_p11, %p200_p12  ;;  %s69_s6 = sadd.s32 1, %s2146_s17 }
  0x28   : > { %s167_s30 = scalar_lea.hbm %s2708_s0, %s1397_s7  ;;  %p2346_p1 = por %p57_p0, %p56_p5 }
  0x29   : > { %s168_s24 = sshll.u32 %s167_s30, 4  ;;  %p76_p3 = scmp.ne.s32.totalorder %s2146_s17, %s2142_s16  ;;  %s169_s24 = int_to_ptr.hbm [resolvable:$true] %s168_s24 }
  0x2a   : > { %1839 = dma.hbm_to_vmem [thread:$0]  (!%p2317_p10), %s169_s24, 4096, %s171_s5, %s157_s3, %s2180_s27, %s2694_s10, %s2695_s11  }
  0x2b   : > { %s2341_s30 = scalar_select %p67_p6, %s2146_s17, %s69_s6  }
  0x2c   : > { %p82_p4 = scmp.ne.s32.totalorder %s2142_s16, %s2138_s15  ;;  %p126_p8 = scmp.ne.s32.totalorder %s2134_s14, %s2130_s13 }
  0x2d   : > { %p2358_p9 = por %p76_p3, %p51_p2  ;;  %p127_p10 = scmp.eq.s32.totalorder %s1390_s28, 5 }
  0x2e   : > { %p2362_p11 = por %p82_p4, %p57_p0  ;;  %p132_p6 = scmp.ne.s32.totalorder %s2130_s13, %s2126_s12 }
  0x2f   : > { %p2368_p5 = por %p127_p10, %p126_p8  ;;  %p133_p12 = scmp.eq.s32.totalorder %s1391_s4, 5 }
  0x30   : > { %s180_s15 = sand.u32 1, %s2146_s17   ;;  %s1572_s5 = sshll.u32 %s2170_s23, 6 }
  0x31   : > { %p2374_p7 = por %p133_p12, %p132_p6  ;;  %s1398_s27 = sshll.u32 %s180_s15, 6 }
  0x32   : > { %s189_s28 = scalar_lea.hbm %s2686_s1, %s1572_s5  ;;  %s184_s0 = scalar_lea.vmem [#allocation6], %s1398_s27 }
  0x33   : > { %s190_s11 = sshll.u32 %s189_s28, 4  ;;  %s192_s9 = sshll.u32 %s184_s0, 4  ;;  %s191_s11 = int_to_ptr.hbm [resolvable:$true] %s190_s11  ;;  %s193_s9 = int_to_ptr.vmem [resolvable:$true] %s192_s9 }
  0x34   : > { %p2715_p2 = scmp.lt.s32.totalorder %s2178_s25, 6  ;;  %s181_s4 = scalar_lea.sflag [#allocation7], %s180_s15 }
  0x35   : > { %s2716_s20 = smov 4   ;;  %s2717_s23 = smov 64  }
  0x36   : > { %p1840_p0 = pnand %p2715_p2, %p2358_p9  ;;  %204 = sbr.rel (%p2331_p13) target bundleno = 484 (0x1e4), region = 32 }
  0x37   : > { %s206_s10 = sand.u32 (!%p2331_p13), 1, %s2154_s19  }
  0x38   : > { %1842 = dma.hbm_to_vmem [thread:$0]  (!%p1840_p0), %s191_s11, 1024, %s193_s9, %s181_s4, %s2717_s23, %s2717_s23, %s2716_s20  }
  0x39   : > { %s1402_s5 = sshll.u32 (!%p2331_p13), %s206_s10, 8  ;;  %s207_s6 = scalar_lea.sflag (!%p2331_p13), [#allocation4], %s206_s10 }
  0x3a   : > { %s2391_s28 = scalar_lea.vmem (!%p2331_p13), [#allocation3], %s1402_s5 }
  0x3b   : > { %2113 = dma.done.wait (%p2346_p1), %s207_s6, 4096  }
  0x3c   : > { %2115 = vsyncadd (%p2346_p1), %s207_s6, 4294963200  ;;  %s216_s0 = sand.u32 1, %s2142_s16  }
  0x3d   : > { %s1403_s24 = sshll.u32 %s216_s0, 6  ;;  %s217_s20 = scalar_lea.sflag [#allocation7], %s216_s0 }
  0x3e   : > { %s2398_s23 = scalar_lea.vmem [#allocation6], %s1403_s24 }
  0x3f   : > { %2117 = dma.done.wait (%p2362_p11), %s217_s20, 1024  }
  0x40   : > { %2119 = vsyncadd (%p2362_p11), %s217_s20, 4294966272  ;;  %s246_s9 = sand.u32 1, %s2130_s13   ;;  %p1405_p13 = scmp.ne.s32.totalorder %s2162_s21, 0 }
  0x41   : > { %s1404_s11 = sshll.u32 %s246_s9, 8 }
  0x42   : > { %s2407_s7 = scalar_lea.vmem [#allocation8], %s1404_s11  ;;  %255 = sbr.rel (%p1405_p13) target bundleno = 136 (0x88), region = 44 }
  0x47   : > { %v2183_v0 = vmov 0.0  }
  0x48   : > { %256 = vst [vmem:[#allocation2 + $0xb0] sm:$0xff] %v2183_v0 }
  0x49   : > { %257 = vst [vmem:[#allocation2 + $0x1b0] sm:$0xff] %v2183_v0 }
  0x4a   : > { %258 = vst [vmem:[#allocation2 + $0xd8] sm:$0xff] %v2183_v0 }
  0x4b   : > { %259 = vst [vmem:[#allocation2 + $0x18] sm:$0xff] %v2183_v0 }
  0x4c   : > { %260 = vst [vmem:[#allocation2 + $0x50] sm:$0xff] %v2183_v0 }
  0x4d   : > { %261 = vst [vmem:[#allocation2 + $0x168] sm:$0xff] %v2183_v0 }
  0x4e   : > { %262 = vst [vmem:[#allocation2 + $0x130] sm:$0xff] %v2183_v0 }
  0x4f   : > { %263 = vst [vmem:[#allocation2 + $0x48] sm:$0xff] %v2183_v0 }
  0x50   : > { %264 = vst [vmem:[#allocation2 + $0x180] sm:$0xff] %v2183_v0 }
  0x51   : > { %265 = vst [vmem:[#allocation2 + $0x110] sm:$0xff] %v2183_v0 }
  0x52   : > { %266 = vst [vmem:[#allocation2 + $0x118] sm:$0xff] %v2183_v0 }
  0x53   : > { %267 = vst [vmem:[#allocation2 + $0x98] sm:$0xff] %v2183_v0 }
  0x54   : > { %268 = vst [vmem:[#allocation2 + $0x120] sm:$0xff] %v2183_v0 }
  0x55   : > { %269 = vst [vmem:[#allocation2 + $0x150] sm:$0xff] %v2183_v0 }
  0x56   : > { %270 = vst [vmem:[#allocation2 + $0x108] sm:$0xff] %v2183_v0 }
  0x57   : > { %271 = vst [vmem:[#allocation2 + $0x60] sm:$0xff] %v2183_v0 }
  0x58   : > { %272 = vst [vmem:[#allocation2 + $0xe0] sm:$0xff] %v2183_v0 }
  0x59   : > { %273 = vst [vmem:[#allocation2 + $0x188] sm:$0xff] %v2183_v0 }
  0x5a   : > { %274 = vst [vmem:[#allocation2 + $0x138] sm:$0xff] %v2183_v0 }
  0x5b   : > { %275 = vst [vmem:[#allocation2 + $0x140] sm:$0xff] %v2183_v0 }
  0x5c   : > { %276 = vst [vmem:[#allocation2 + $0x80] sm:$0xff] %v2183_v0 }
  0x5d   : > { %277 = vst [vmem:[#allocation2 + $0x1a8] sm:$0xff] %v2183_v0 }
  0x5e   : > { %278 = vst [vmem:[#allocation2 + $0x1b8] sm:$0xff] %v2183_v0 }
  0x5f   : > { %279 = vst [vmem:[#allocation2 + $0x28] sm:$0xff] %v2183_v0 }
  0x60   : > { %280 = vst [vmem:[#allocation2 + $0x1e8] sm:$0xff] %v2183_v0 }
  0x61   : > { %281 = vst [vmem:[#allocation2 + $0xf8] sm:$0xff] %v2183_v0 }
  0x62   : > { %282 = vst [vmem:[#allocation2 + $0x160] sm:$0xff] %v2183_v0 }
  0x63   : > { %283 = vst [vmem:[#allocation2 + $0x30] sm:$0xff] %v2183_v0 }
  0x64   : > { %284 = vst [vmem:[#allocation2 + $0x1e0] sm:$0xff] %v2183_v0 }
  0x65   : > { %285 = vst [vmem:[#allocation2] sm:$0xff] %v2183_v0 }
  0x66   : > { %286 = vst [vmem:[#allocation2 + $0xf0] sm:$0xff] %v2183_v0 }
  0x67   : > { %287 = vst [vmem:[#allocation2 + $0x8] sm:$0xff] %v2183_v0 }
  0x68   : > { %288 = vst [vmem:[#allocation2 + $0x148] sm:$0xff] %v2183_v0 }
  0x69   : > { %289 = vst [vmem:[#allocation2 + $0x1d0] sm:$0xff] %v2183_v0 }
  0x6a   : > { %290 = vst [vmem:[#allocation2 + $0x100] sm:$0xff] %v2183_v0 }
  0x6b   : > { %291 = vst [vmem:[#allocation2 + $0xc8] sm:$0xff] %v2183_v0 }
  0x6c   : > { %292 = vst [vmem:[#allocation2 + $0x40] sm:$0xff] %v2183_v0 }
  0x6d   : > { %293 = vst [vmem:[#allocation2 + $0x1f8] sm:$0xff] %v2183_v0 }
  0x6e   : > { %294 = vst [vmem:[#allocation2 + $0x20] sm:$0xff] %v2183_v0 }
  0x6f   : > { %295 = vst [vmem:[#allocation2 + $0x128] sm:$0xff] %v2183_v0 }
  0x70   : > { %296 = vst [vmem:[#allocation2 + $0x1a0] sm:$0xff] %v2183_v0 }
  0x71   : > { %297 = vst [vmem:[#allocation2 + $0x1f0] sm:$0xff] %v2183_v0 }
  0x72   : > { %298 = vst [vmem:[#allocation2 + $0xe8] sm:$0xff] %v2183_v0 }
  0x73   : > { %299 = vst [vmem:[#allocation2 + $0x78] sm:$0xff] %v2183_v0 }
  0x74   : > { %300 = vst [vmem:[#allocation2 + $0x70] sm:$0xff] %v2183_v0 }
  0x75   : > { %301 = vst [vmem:[#allocation2 + $0x90] sm:$0xff] %v2183_v0 }
  0x76   : > { %302 = vst [vmem:[#allocation2 + $0x1d8] sm:$0xff] %v2183_v0 }
  0x77   : > { %303 = vst [vmem:[#allocation2 + $0xd0] sm:$0xff] %v2183_v0 }
  0x78   : > { %304 = vst [vmem:[#allocation2 + $0xb8] sm:$0xff] %v2183_v0 }
  0x79   : > { %305 = vst [vmem:[#allocation2 + $0x88] sm:$0xff] %v2183_v0 }
  0x7a   : > { %306 = vst [vmem:[#allocation2 + $0xa8] sm:$0xff] %v2183_v0 }
  0x7b   : > { %307 = vst [vmem:[#allocation2 + $0x1c8] sm:$0xff] %v2183_v0 }
  0x7c   : > { %308 = vst [vmem:[#allocation2 + $0x170] sm:$0xff] %v2183_v0 }
  0x7d   : > { %309 = vst [vmem:[#allocation2 + $0x178] sm:$0xff] %v2183_v0 }
  0x7e   : > { %310 = vst [vmem:[#allocation2 + $0x68] sm:$0xff] %v2183_v0 }
  0x7f   : > { %311 = vst [vmem:[#allocation2 + $0x190] sm:$0xff] %v2183_v0 }
  0x80   : > { %312 = vst [vmem:[#allocation2 + $0x198] sm:$0xff] %v2183_v0 }
  0x81   : > { %313 = vst [vmem:[#allocation2 + $0x38] sm:$0xff] %v2183_v0 }
  0x82   : > { %314 = vst [vmem:[#allocation2 + $0xc0] sm:$0xff] %v2183_v0 }
  0x83   : > { %315 = vst [vmem:[#allocation2 + $0x1c0] sm:$0xff] %v2183_v0 }
  0x84   : > { %316 = vst [vmem:[#allocation2 + $0x158] sm:$0xff] %v2183_v0 }
  0x85   : > { %317 = vst [vmem:[#allocation2 + $0x10] sm:$0xff] %v2183_v0 }
  0x86   : > { %318 = vst [vmem:[#allocation2 + $0x58] sm:$0xff] %v2183_v0 }
  0x87   : > { %319 = vst [vmem:[#allocation2 + $0xa0] sm:$0xff] %v2183_v0 }
  0x88 PF: > { %v1612_v1 = vld [vmem:[%s2398_s23 + $0x38] sm:$0xff]  ;;  %v1611_v2 = vld [vmem:[%s2398_s23 + $0x30] sm:$0xff]  ;;  %v1610_v3 = vld [vmem:[%s2398_s23 + $0x28] sm:$0xff]  ;;  %p1566_p1 = scmp.ne.s32.totalorder %s2162_s21, 2 }
  0x89   : > { %704 = vmatpush.bf16.msra.mxu0 %v1612_v1  ;;  %1805 = vmatpush.bf16.msra.mxu1 %v1612_v1  ;;  %v1609_v4 = vld [vmem:[%s2398_s23 + $0x20] sm:$0xff]  ;;  %v1608_v5 = vld [vmem:[%s2398_s23 + $0x18] sm:$0xff]  ;;  %v1607_v6 = vld [vmem:[%s2398_s23 + $0x10] sm:$0xff] }
  0x8a   : > { %1806 = vmatpush.bf16.msra.mxu2 %v1612_v1  ;;  %1807 = vmatpush.bf16.msra.mxu3 %v1612_v1  ;;  %v1606_v7 = vld [vmem:[%s2398_s23 + $0x8] sm:$0xff]  ;;  %v1605_v8 = vld [vmem:[%s2398_s23] sm:$0xff]  ;;  %v1575_v17 = vld [vmem:[%s2391_s28 + $0x10] sm:$0xff] }
  0x8b   : > { %v1573_v9 = vld [vmem:[%s2391_s28] sm:$0xff]  ;;  %v1574_v13 = vld [vmem:[%s2391_s28 + $0x8] sm:$0xff]  ;;  %v1583_v18 = vld [vmem:[%s2391_s28 + $0x50] sm:$0xff] }
  0x8c   : > { %v1581_v10 = vld [vmem:[%s2391_s28 + $0x40] sm:$0xff]  ;;  %v1582_v14 = vld [vmem:[%s2391_s28 + $0x48] sm:$0xff]  ;;  %v1591_v19 = vld [vmem:[%s2391_s28 + $0x90] sm:$0xff] }
  0x8d   : > { %705 = vmatpush.bf16.msra.mxu0 %v1611_v2  ;;  %1808 = vmatpush.bf16.msra.mxu1 %v1611_v2  ;;  %v1589_v11 = vld [vmem:[%s2391_s28 + $0x80] sm:$0xff]  ;;  %v1590_v15 = vld [vmem:[%s2391_s28 + $0x88] sm:$0xff]  ;;  %v1599_v20 = vld [vmem:[%s2391_s28 + $0xd0] sm:$0xff] }
  0x8e   : > { %1809 = vmatpush.bf16.msra.mxu2 %v1611_v2  ;;  %1810 = vmatpush.bf16.msra.mxu3 %v1611_v2  ;;  %v1597_v12 = vld [vmem:[%s2391_s28 + $0xc0] sm:$0xff]  ;;  %v1598_v16 = vld [vmem:[%s2391_s28 + $0xc8] sm:$0xff]  ;;  %v1576_v21 = vld [vmem:[%s2391_s28 + $0x18] sm:$0xff] }
  0x8f   : > { %v1584_v22 = vld [vmem:[%s2391_s28 + $0x58] sm:$0xff]  ;;  %v1577_v25 = vld [vmem:[%s2391_s28 + $0x20] sm:$0xff]  ;;  %v1578_v29 = vld [vmem:[%s2391_s28 + $0x28] sm:$0xff] }
  0x90   : > { %v1592_v23 = vld [vmem:[%s2391_s28 + $0x98] sm:$0xff]  ;;  %v1585_v26 = vld [vmem:[%s2391_s28 + $0x60] sm:$0xff]  ;;  %v1586_v30 = vld [vmem:[%s2391_s28 + $0x68] sm:$0xff] }
  0x91   : > { %706 = vmatpush.bf16.msra.mxu0 %v1610_v3  ;;  %1811 = vmatpush.bf16.msra.mxu1 %v1610_v3  ;;  %v1600_v24 = vld [vmem:[%s2391_s28 + $0xd8] sm:$0xff]  ;;  %v1593_v27 = vld [vmem:[%s2391_s28 + $0xa0] sm:$0xff]  ;;  %v1594_v31 = vld [vmem:[%s2391_s28 + $0xa8] sm:$0xff] }
  0x92   : > { %1812 = vmatpush.bf16.msra.mxu2 %v1610_v3  ;;  %1813 = vmatpush.bf16.msra.mxu3 %v1610_v3  ;;  %v1601_v28 = vld [vmem:[%s2391_s28 + $0xe0] sm:$0xff]  ;;  %v1602_v32 = vld [vmem:[%s2391_s28 + $0xe8] sm:$0xff]  ;;  %v1579_v33 = vld [vmem:[%s2391_s28 + $0x30] sm:$0xff] }
  0x93   : > { %v1587_v34 = vld [vmem:[%s2391_s28 + $0x70] sm:$0xff]  ;;  %v1580_v37 = vld [vmem:[%s2391_s28 + $0x38] sm:$0xff]  ;;  %v336_v42 = vld [vmem:[#allocation2 + $0xe0] sm:$0xff] }
  0x94   : > { %v1595_v35 = vld [vmem:[%s2391_s28 + $0xb0] sm:$0xff]  ;;  %v1588_v38 = vld [vmem:[%s2391_s28 + $0x78] sm:$0xff]  ;;  %v352_v47 = vld [vmem:[#allocation2 + $0x148] sm:$0xff] }
  0x95   : > { %707 = vmatpush.bf16.msra.mxu0 %v1609_v4  ;;  %1814 = vmatpush.bf16.msra.mxu1 %v1609_v4  ;;  %v1603_v36 = vld [vmem:[%s2391_s28 + $0xf0] sm:$0xff]  ;;  %v1596_v39 = vld [vmem:[%s2391_s28 + $0xb8] sm:$0xff]  ;;  %v337_v50 = vld [vmem:[#allocation2 + $0x188] sm:$0xff] }
  0x96   : > { %1815 = vmatpush.bf16.msra.mxu2 %v1609_v4  ;;  %1816 = vmatpush.bf16.msra.mxu3 %v1609_v4  ;;  %v1604_v40 = vld [vmem:[%s2391_s28 + $0xf8] sm:$0xff]  ;;  %v320_v41 = vld [vmem:[#allocation2 + $0xb0] sm:$0xff]  ;;  %v369_v60 = vld [vmem:[#allocation2 + $0x88] sm:$0xff] }
  0x97   : > { %v368_v48 = vld [vmem:[#allocation2 + $0xb8] sm:$0xff]  ;;  %v321_v49 = vld [vmem:[#allocation2 + $0x1b0] sm:$0xff] }
  0x98   : > { %v353_v59 = vld [vmem:[#allocation2 + $0x1d0] sm:$0xff]  ;;  %v322_v61 = vld [vmem:[#allocation2 + $0xd8] sm:$0xff] }
  0x99   : > { %708 = vmatpush.bf16.msra.mxu0 %v1608_v5  ;;  %1817 = vmatpush.bf16.msra.mxu1 %v1608_v5  ;;  %v338_v62 = vld [vmem:[#allocation2 + $0x138] sm:$0xff] }
  0x9a   : > { %1818 = vmatpush.bf16.msra.mxu2 %v1608_v5  ;;  %1819 = vmatpush.bf16.msra.mxu3 %v1608_v5 }
  0x9d   : > { %709 = vmatpush.bf16.msra.mxu0 %v1607_v6  ;;  %1820 = vmatpush.bf16.msra.mxu1 %v1607_v6 }
  0x9e   : > { %1821 = vmatpush.bf16.msra.mxu2 %v1607_v6  ;;  %1822 = vmatpush.bf16.msra.mxu3 %v1607_v6 }
  0xa1   : > { %710 = vmatpush.bf16.msra.mxu0 %v1606_v7  ;;  %1823 = vmatpush.bf16.msra.mxu1 %v1606_v7 }
  0xa2   : > { %1824 = vmatpush.bf16.msra.mxu2 %v1606_v7  ;;  %1825 = vmatpush.bf16.msra.mxu3 %v1606_v7  ;;  %v354_v7 = vld [vmem:[#allocation2 + $0x100] sm:$0xff] }
  0xa5   : > { %711 = vmatpush.bf16.msra.mxu0 %v1605_v8  ;;  %1826 = vmatpush.bf16.msra.mxu1 %v1605_v8 }
  0xa6   : > { %1827 = vmatpush.bf16.msra.mxu2 %v1605_v8  ;;  %1828 = vmatpush.bf16.msra.mxu3 %v1605_v8  ;;  %v370_v8 = vld [vmem:[#allocation2 + $0xa8] sm:$0xff] }
  0xa8   : > { %712 = vmatmul.bf16.vlgmr.msra.gmra.mxu0 %v1573_v9  ;;  %752 = vmatmul.bf16.vlgmr.msra.gmra.mxu1 %v1581_v10  ;;  %v323_v9 = vld [vmem:[#allocation2 + $0x18] sm:$0xff]  ;;  %v339_v10 = vld [vmem:[#allocation2 + $0x140] sm:$0xff] }
  0xa9   : > { %792 = vmatmul.bf16.vlgmr.msra.gmra.mxu2 %v1589_v11  ;;  %832 = vmatmul.bf16.vlgmr.msra.gmra.mxu3 %v1597_v12 }
  0xb8   : > { %717 = vmatmul.bf16.gmra.mxu0 %v1574_v13  ;;  %757 = vmatmul.bf16.gmra.mxu1 %v1582_v14 }
  0xb9   : > { %797 = vmatmul.bf16.gmra.mxu2 %v1590_v15  ;;  %837 = vmatmul.bf16.gmra.mxu3 %v1598_v16 }
  0xc8   : > { %722 = vmatmul.bf16.gmra.mxu0 %v1575_v17  ;;  %762 = vmatmul.bf16.gmra.mxu1 %v1583_v18 }
  0xc9   : > { %802 = vmatmul.bf16.gmra.mxu2 %v1591_v19  ;;  %842 = vmatmul.bf16.gmra.mxu3 %v1599_v20  ;;  %v355_v19 = vld [vmem:[#allocation2 + $0xc8] sm:$0xff] }
  0xca   : > { %v371_v20 = vld [vmem:[#allocation2 + $0x1c8] sm:$0xff] }
  0xd8   : > { %727 = vmatmul.bf16.gmra.mxu0 %v1576_v21  ;;  %767 = vmatmul.bf16.gmra.mxu1 %v1584_v22  ;;  %v324_v21 = vld [vmem:[#allocation2 + $0x50] sm:$0xff]  ;;  %v340_v22 = vld [vmem:[#allocation2 + $0x80] sm:$0xff] }
  0xd9   : > { %807 = vmatmul.bf16.gmra.mxu2 %v1592_v23  ;;  %847 = vmatmul.bf16.gmra.mxu3 %v1600_v24 }
  0xe8   : > { %732 = vmatmul.bf16.gmra.mxu0 %v1577_v25  ;;  %772 = vmatmul.bf16.gmra.mxu1 %v1585_v26 }
  0xe9   : > { %812 = vmatmul.bf16.gmra.mxu2 %v1593_v27  ;;  %852 = vmatmul.bf16.gmra.mxu3 %v1601_v28 }
  0xf8   : > { %737 = vmatmul.bf16.gmra.mxu0 %v1578_v29  ;;  %777 = vmatmul.bf16.gmra.mxu1 %v1586_v30 }
  0xf9   : > { %817 = vmatmul.bf16.gmra.mxu2 %v1594_v31  ;;  %857 = vmatmul.bf16.gmra.mxu3 %v1602_v32  ;;  %v356_v31 = vld [vmem:[#allocation2 + $0x40] sm:$0xff]  ;;  %v372_v32 = vld [vmem:[#allocation2 + $0x170] sm:$0xff] }
 0x108   : > { %742 = vmatmul.bf16.gmra.mxu0 %v1579_v33  ;;  %782 = vmatmul.bf16.gmra.mxu1 %v1587_v34  ;;  %v325_v33 = vld [vmem:[#allocation2 + $0x168] sm:$0xff] }
 0x109   : > { %822 = vmatmul.bf16.gmra.mxu2 %v1595_v35  ;;  %862 = vmatmul.bf16.gmra.mxu3 %v1603_v36  ;;  %v341_v34 = vld [vmem:[#allocation2 + $0x1a8] sm:$0xff] }
 0x118   : > { %747 = vmatmul.bf16.gmra.mxu0 %v1580_v37  ;;  %787 = vmatmul.bf16.gmra.mxu1 %v1588_v38 }
 0x119   : > { %827 = vmatmul.bf16.gmra.mxu2 %v1596_v39  ;;  %867 = vmatmul.bf16.gmra.mxu3 %v1604_v40 }
 0x125   : > { %v713_v43 = vpop.f32.mrf.mxu0  ;;  %v753_v44 = vpop.f32.mrf.mxu1 }
 0x126   : > { %v873_v45 = vadd.f32 %v713_v43, %v320_v41  ;;  %v889_v46 = vadd.f32 %v753_v44, %v336_v42  ;;  %v357_v43 = vld [vmem:[#allocation2 + $0x1f8] sm:$0xff] }
 0x127   : > { %v373_v44 = vld [vmem:[#allocation2 + $0x178] sm:$0xff] }
 0x128   : > { %937 = vst [vmem:[#allocation2 + $0xb0] sm:$0xff] %v873_v45  ;;  %v326_v45 = vld [vmem:[#allocation2 + $0x130] sm:$0xff] }
 0x129   : > { %953 = vst [vmem:[#allocation2 + $0xe0] sm:$0xff] %v889_v46  ;;  %v342_v46 = vld [vmem:[#allocation2 + $0x1b8] sm:$0xff] }
 0x12c   : > { %v793_v51 = vpop.f32.mrf.mxu2  ;;  %v833_v52 = vpop.f32.mrf.mxu3 }
 0x12d   : > { %v905_v53 = vadd.f32 %v793_v51, %v352_v47  ;;  %v921_v54 = vadd.f32 %v833_v52, %v368_v48  ;;  %v715_v55 = vpop.f32.mrf.mxu0  ;;  %v755_v56 = vpop.f32.mrf.mxu1 }
 0x12e   : > { %v874_v57 = vadd.f32 %v715_v55, %v321_v49  ;;  %v890_v58 = vadd.f32 %v755_v56, %v337_v50  ;;  %v358_v55 = vld [vmem:[#allocation2 + $0x20] sm:$0xff]  ;;  %v374_v56 = vld [vmem:[#allocation2 + $0x68] sm:$0xff] }
 0x12f   : > { %969 = vst [vmem:[#allocation2 + $0x148] sm:$0xff] %v905_v53 }
 0x130   : > { %985 = vst [vmem:[#allocation2 + $0xb8] sm:$0xff] %v921_v54 }
 0x131   : > { %938 = vst [vmem:[#allocation2 + $0x1b0] sm:$0xff] %v874_v57  ;;  %v327_v57 = vld [vmem:[#allocation2 + $0x48] sm:$0xff] }
 0x132   : > { %954 = vst [vmem:[#allocation2 + $0x188] sm:$0xff] %v890_v58  ;;  %v343_v58 = vld [vmem:[#allocation2 + $0x28] sm:$0xff] }
 0x134   : > { %v795_v63 = vpop.f32.mrf.mxu2  ;;  %v835_v0 = vpop.f32.mrf.mxu3 }
 0x135   : > { %v906_v1 = vadd.f32 %v795_v63, %v353_v59  ;;  %v922_v2 = vadd.f32 %v835_v0, %v369_v60  ;;  %v718_v3 = vpop.f32.mrf.mxu0  ;;  %v758_v4 = vpop.f32.mrf.mxu1 }
 0x136   : > { %v875_v5 = vadd.f32 %v718_v3, %v322_v61  ;;  %v891_v6 = vadd.f32 %v758_v4, %v338_v62  ;;  %v359_v3 = vld [vmem:[#allocation2 + $0x128] sm:$0xff]  ;;  %v375_v4 = vld [vmem:[#allocation2 + $0x190] sm:$0xff] }
 0x137   : > { %970 = vst [vmem:[#allocation2 + $0x1d0] sm:$0xff] %v906_v1 }
 0x138   : > { %986 = vst [vmem:[#allocation2 + $0x88] sm:$0xff] %v922_v2 }
 0x139   : > { %939 = vst [vmem:[#allocation2 + $0xd8] sm:$0xff] %v875_v5  ;;  %v328_v5 = vld [vmem:[#allocation2 + $0x180] sm:$0xff] }
 0x13a   : > { %955 = vst [vmem:[#allocation2 + $0x138] sm:$0xff] %v891_v6  ;;  %v344_v6 = vld [vmem:[#allocation2 + $0x1e8] sm:$0xff] }
 0x13c   : > { %v798_v11 = vpop.f32.mrf.mxu2  ;;  %v838_v12 = vpop.f32.mrf.mxu3 }
 0x13d   : > { %v907_v13 = vadd.f32 %v798_v11, %v354_v7  ;;  %v923_v14 = vadd.f32 %v838_v12, %v370_v8  ;;  %v720_v15 = vpop.f32.mrf.mxu0  ;;  %v760_v16 = vpop.f32.mrf.mxu1 }
 0x13e   : > { %v876_v17 = vadd.f32 %v720_v15, %v323_v9  ;;  %v892_v18 = vadd.f32 %v760_v16, %v339_v10  ;;  %v360_v15 = vld [vmem:[#allocation2 + $0x1a0] sm:$0xff]  ;;  %v376_v16 = vld [vmem:[#allocation2 + $0x198] sm:$0xff] }
 0x13f   : > { %971 = vst [vmem:[#allocation2 + $0x100] sm:$0xff] %v907_v13 }
 0x140   : > { %987 = vst [vmem:[#allocation2 + $0xa8] sm:$0xff] %v923_v14 }
 0x141   : > { %940 = vst [vmem:[#allocation2 + $0x18] sm:$0xff] %v876_v17  ;;  %v329_v17 = vld [vmem:[#allocation2 + $0x110] sm:$0xff] }
 0x142   : > { %956 = vst [vmem:[#allocation2 + $0x140] sm:$0xff] %v892_v18  ;;  %v345_v18 = vld [vmem:[#allocation2 + $0xf8] sm:$0xff] }
 0x144   : > { %v800_v23 = vpop.f32.mrf.mxu2  ;;  %v840_v24 = vpop.f32.mrf.mxu3 }
 0x145   : > { %v908_v25 = vadd.f32 %v800_v23, %v355_v19  ;;  %v924_v26 = vadd.f32 %v840_v24, %v371_v20  ;;  %v723_v27 = vpop.f32.mrf.mxu0  ;;  %v763_v28 = vpop.f32.mrf.mxu1 }
 0x146   : > { %v877_v29 = vadd.f32 %v723_v27, %v324_v21  ;;  %v893_v30 = vadd.f32 %v763_v28, %v340_v22  ;;  %v361_v27 = vld [vmem:[#allocation2 + $0x1f0] sm:$0xff]  ;;  %v377_v28 = vld [vmem:[#allocation2 + $0x38] sm:$0xff] }
 0x147   : > { %972 = vst [vmem:[#allocation2 + $0xc8] sm:$0xff] %v908_v25 }
 0x148   : > { %988 = vst [vmem:[#allocation2 + $0x1c8] sm:$0xff] %v924_v26 }
 0x149   : > { %941 = vst [vmem:[#allocation2 + $0x50] sm:$0xff] %v877_v29  ;;  %v330_v29 = vld [vmem:[#allocation2 + $0x118] sm:$0xff] }
 0x14a   : > { %957 = vst [vmem:[#allocation2 + $0x80] sm:$0xff] %v893_v30  ;;  %v346_v30 = vld [vmem:[#allocation2 + $0x160] sm:$0xff] }
 0x14c   : > { %v803_v35 = vpop.f32.mrf.mxu2  ;;  %v843_v36 = vpop.f32.mrf.mxu3 }
 0x14d   : > { %v909_v37 = vadd.f32 %v803_v35, %v356_v31  ;;  %v925_v38 = vadd.f32 %v843_v36, %v372_v32  ;;  %v725_v39 = vpop.f32.mrf.mxu0  ;;  %v765_v40 = vpop.f32.mrf.mxu1 }
 0x14e   : > { %v878_v41 = vadd.f32 %v725_v39, %v325_v33  ;;  %v894_v42 = vadd.f32 %v765_v40, %v341_v34  ;;  %v362_v39 = vld [vmem:[#allocation2 + $0xe8] sm:$0xff]  ;;  %v378_v40 = vld [vmem:[#allocation2 + $0xc0] sm:$0xff] }
 0x14f   : > { %973 = vst [vmem:[#allocation2 + $0x40] sm:$0xff] %v909_v37 }
 0x150   : > { %989 = vst [vmem:[#allocation2 + $0x170] sm:$0xff] %v925_v38 }
 0x151   : > { %942 = vst [vmem:[#allocation2 + $0x168] sm:$0xff] %v878_v41  ;;  %v331_v41 = vld [vmem:[#allocation2 + $0x98] sm:$0xff] }
 0x152   : > { %958 = vst [vmem:[#allocation2 + $0x1a8] sm:$0xff] %v894_v42  ;;  %v347_v42 = vld [vmem:[#allocation2 + $0x30] sm:$0xff] }
 0x154   : > { %v805_v47 = vpop.f32.mrf.mxu2  ;;  %v845_v48 = vpop.f32.mrf.mxu3 }
 0x155   : > { %v910_v49 = vadd.f32 %v805_v47, %v357_v43  ;;  %v926_v50 = vadd.f32 %v845_v48, %v373_v44  ;;  %v728_v51 = vpop.f32.mrf.mxu0  ;;  %v768_v52 = vpop.f32.mrf.mxu1 }
 0x156   : > { %v879_v53 = vadd.f32 %v728_v51, %v326_v45  ;;  %v895_v54 = vadd.f32 %v768_v52, %v342_v46  ;;  %v363_v51 = vld [vmem:[#allocation2 + $0x78] sm:$0xff]  ;;  %v379_v52 = vld [vmem:[#allocation2 + $0x1c0] sm:$0xff] }
 0x157   : > { %974 = vst [vmem:[#allocation2 + $0x1f8] sm:$0xff] %v910_v49 }
 0x158   : > { %990 = vst [vmem:[#allocation2 + $0x178] sm:$0xff] %v926_v50 }
 0x159   : > { %943 = vst [vmem:[#allocation2 + $0x130] sm:$0xff] %v879_v53  ;;  %v332_v53 = vld [vmem:[#allocation2 + $0x120] sm:$0xff] }
 0x15a   : > { %959 = vst [vmem:[#allocation2 + $0x1b8] sm:$0xff] %v895_v54  ;;  %v348_v54 = vld [vmem:[#allocation2 + $0x1e0] sm:$0xff] }
 0x15c   : > { %v808_v59 = vpop.f32.mrf.mxu2  ;;  %v848_v60 = vpop.f32.mrf.mxu3 }
 0x15d   : > { %v911_v61 = vadd.f32 %v808_v59, %v358_v55  ;;  %v927_v62 = vadd.f32 %v848_v60, %v374_v56  ;;  %v730_v63 = vpop.f32.mrf.mxu0  ;;  %v770_v0 = vpop.f32.mrf.mxu1 }
 0x15e   : > { %v880_v1 = vadd.f32 %v730_v63, %v327_v57  ;;  %v896_v2 = vadd.f32 %v770_v0, %v343_v58  ;;  %v364_v63 = vld [vmem:[#allocation2 + $0x70] sm:$0xff]  ;;  %v380_v0 = vld [vmem:[#allocation2 + $0x158] sm:$0xff] }
 0x15f   : > { %975 = vst [vmem:[#allocation2 + $0x20] sm:$0xff] %v911_v61 }
 0x160   : > { %991 = vst [vmem:[#allocation2 + $0x68] sm:$0xff] %v927_v62 }
 0x161   : > { %944 = vst [vmem:[#allocation2 + $0x48] sm:$0xff] %v880_v1  ;;  %v333_v1 = vld [vmem:[#allocation2 + $0x150] sm:$0xff] }
 0x162   : > { %960 = vst [vmem:[#allocation2 + $0x28] sm:$0xff] %v896_v2  ;;  %v349_v2 = vld [vmem:[#allocation2] sm:$0xff] }
 0x164   : > { %v810_v7 = vpop.f32.mrf.mxu2  ;;  %v850_v8 = vpop.f32.mrf.mxu3 }
 0x165   : > { %v912_v9 = vadd.f32 %v810_v7, %v359_v3  ;;  %v928_v10 = vadd.f32 %v850_v8, %v375_v4  ;;  %v733_v11 = vpop.f32.mrf.mxu0  ;;  %v773_v12 = vpop.f32.mrf.mxu1 }
 0x166   : > { %v881_v13 = vadd.f32 %v733_v11, %v328_v5  ;;  %v897_v14 = vadd.f32 %v773_v12, %v344_v6  ;;  %v365_v11 = vld [vmem:[#allocation2 + $0x90] sm:$0xff] }
 0x167   : > { %976 = vst [vmem:[#allocation2 + $0x128] sm:$0xff] %v912_v9  ;;  %v381_v12 = vld [vmem:[#allocation2 + $0x10] sm:$0xff] }
 0x168   : > { %992 = vst [vmem:[#allocation2 + $0x190] sm:$0xff] %v928_v10 }
 0x169   : > { %945 = vst [vmem:[#allocation2 + $0x180] sm:$0xff] %v881_v13  ;;  %v334_v13 = vld [vmem:[#allocation2 + $0x108] sm:$0xff] }
 0x16a   : > { %961 = vst [vmem:[#allocation2 + $0x1e8] sm:$0xff] %v897_v14  ;;  %v350_v14 = vld [vmem:[#allocation2 + $0xf0] sm:$0xff] }
 0x16c   : > { %v813_v19 = vpop.f32.mrf.mxu2  ;;  %v853_v20 = vpop.f32.mrf.mxu3 }
 0x16d   : > { %v913_v21 = vadd.f32 %v813_v19, %v360_v15  ;;  %v929_v22 = vadd.f32 %v853_v20, %v376_v16  ;;  %v735_v23 = vpop.f32.mrf.mxu0  ;;  %v775_v24 = vpop.f32.mrf.mxu1 }
 0x16e   : > { %v882_v25 = vadd.f32 %v735_v23, %v329_v17  ;;  %v898_v26 = vadd.f32 %v775_v24, %v345_v18  ;;  %v366_v23 = vld [vmem:[#allocation2 + $0x1d8] sm:$0xff] }
 0x16f   : > { %977 = vst [vmem:[#allocation2 + $0x1a0] sm:$0xff] %v913_v21  ;;  %v382_v24 = vld [vmem:[#allocation2 + $0x58] sm:$0xff] }
 0x170   : > { %993 = vst [vmem:[#allocation2 + $0x198] sm:$0xff] %v929_v22 }
 0x171   : > { %946 = vst [vmem:[#allocation2 + $0x110] sm:$0xff] %v882_v25  ;;  %v335_v25 = vld [vmem:[#allocation2 + $0x60] sm:$0xff] }
 0x172   : > { %962 = vst [vmem:[#allocation2 + $0xf8] sm:$0xff] %v898_v26  ;;  %v351_v26 = vld [vmem:[#allocation2 + $0x8] sm:$0xff] }
 0x174   : > { %v815_v31 = vpop.f32.mrf.mxu2  ;;  %v855_v32 = vpop.f32.mrf.mxu3 }
 0x175   : > { %v914_v33 = vadd.f32 %v815_v31, %v361_v27  ;;  %v930_v34 = vadd.f32 %v855_v32, %v377_v28  ;;  %v738_v35 = vpop.f32.mrf.mxu0  ;;  %v778_v36 = vpop.f32.mrf.mxu1 }
 0x176   : > { %v883_v37 = vadd.f32 %v738_v35, %v330_v29  ;;  %v899_v38 = vadd.f32 %v778_v36, %v346_v30  ;;  %v367_v35 = vld [vmem:[#allocation2 + $0xd0] sm:$0xff]  ;;  %v383_v36 = vld [vmem:[#allocation2 + $0xa0] sm:$0xff] }
 0x177   : > { %978 = vst [vmem:[#allocation2 + $0x1f0] sm:$0xff] %v914_v33 }
 0x178   : > { %994 = vst [vmem:[#allocation2 + $0x38] sm:$0xff] %v930_v34 }
 0x179   : > { %947 = vst [vmem:[#allocation2 + $0x118] sm:$0xff] %v883_v37 }
 0x17a   : > { %963 = vst [vmem:[#allocation2 + $0x160] sm:$0xff] %v899_v38 }
 0x17c   : > { %v818_v43 = vpop.f32.mrf.mxu2  ;;  %v858_v44 = vpop.f32.mrf.mxu3 }
 0x17d   : > { %v915_v45 = vadd.f32 %v818_v43, %v362_v39  ;;  %v931_v46 = vadd.f32 %v858_v44, %v378_v40  ;;  %v740_v47 = vpop.f32.mrf.mxu0  ;;  %v780_v48 = vpop.f32.mrf.mxu1 }
 0x17e   : > { %v884_v49 = vadd.f32 %v740_v47, %v331_v41  ;;  %v900_v50 = vadd.f32 %v780_v48, %v347_v42 }
 0x17f   : > { %979 = vst [vmem:[#allocation2 + $0xe8] sm:$0xff] %v915_v45 }
 0x180   : > { %995 = vst [vmem:[#allocation2 + $0xc0] sm:$0xff] %v931_v46 }
 0x181   : > { %948 = vst [vmem:[#allocation2 + $0x98] sm:$0xff] %v884_v49 }
 0x182   : > { %964 = vst [vmem:[#allocation2 + $0x30] sm:$0xff] %v900_v50 }
 0x184   : > { %v820_v55 = vpop.f32.mrf.mxu2  ;;  %v860_v56 = vpop.f32.mrf.mxu3 }
 0x185   : > { %v916_v57 = vadd.f32 %v820_v55, %v363_v51  ;;  %v932_v58 = vadd.f32 %v860_v56, %v379_v52  ;;  %v743_v59 = vpop.f32.mrf.mxu0  ;;  %v783_v60 = vpop.f32.mrf.mxu1 }
 0x186   : > { %v885_v61 = vadd.f32 %v743_v59, %v332_v53  ;;  %v901_v62 = vadd.f32 %v783_v60, %v348_v54 }
 0x187   : > { %980 = vst [vmem:[#allocation2 + $0x78] sm:$0xff] %v916_v57 }
 0x188   : > { %996 = vst [vmem:[#allocation2 + $0x1c0] sm:$0xff] %v932_v58 }
 0x189   : > { %949 = vst [vmem:[#allocation2 + $0x120] sm:$0xff] %v885_v61 }
 0x18a   : > { %965 = vst [vmem:[#allocation2 + $0x1e0] sm:$0xff] %v901_v62 }
 0x18c   : > { %v823_v3 = vpop.f32.mrf.mxu2  ;;  %v863_v4 = vpop.f32.mrf.mxu3 }
 0x18d   : > { %v917_v5 = vadd.f32 %v823_v3, %v364_v63  ;;  %v933_v6 = vadd.f32 %v863_v4, %v380_v0  ;;  %v745_v7 = vpop.f32.mrf.mxu0  ;;  %v785_v8 = vpop.f32.mrf.mxu1 }
 0x18e   : > { %v886_v9 = vadd.f32 %v745_v7, %v333_v1  ;;  %v902_v10 = vadd.f32 %v785_v8, %v349_v2 }
 0x18f   : > { %981 = vst [vmem:[#allocation2 + $0x70] sm:$0xff] %v917_v5 }
 0x190   : > { %997 = vst [vmem:[#allocation2 + $0x158] sm:$0xff] %v933_v6 }
 0x191   : > { %950 = vst [vmem:[#allocation2 + $0x150] sm:$0xff] %v886_v9 }
 0x192   : > { %966 = vst [vmem:[#allocation2] sm:$0xff] %v902_v10 }
 0x194   : > { %v825_v15 = vpop.f32.mrf.mxu2  ;;  %v865_v16 = vpop.f32.mrf.mxu3 }
 0x195   : > { %v918_v17 = vadd.f32 %v825_v15, %v365_v11  ;;  %v934_v18 = vadd.f32 %v865_v16, %v381_v12  ;;  %v748_v19 = vpop.f32.mrf.mxu0  ;;  %v788_v20 = vpop.f32.mrf.mxu1 }
 0x196   : > { %v887_v21 = vadd.f32 %v748_v19, %v334_v13  ;;  %v903_v22 = vadd.f32 %v788_v20, %v350_v14 }
 0x197   : > { %982 = vst [vmem:[#allocation2 + $0x90] sm:$0xff] %v918_v17 }
 0x198   : > { %998 = vst [vmem:[#allocation2 + $0x10] sm:$0xff] %v934_v18 }
 0x199   : > { %951 = vst [vmem:[#allocation2 + $0x108] sm:$0xff] %v887_v21 }
 0x19a   : > { %967 = vst [vmem:[#allocation2 + $0xf0] sm:$0xff] %v903_v22 }
 0x19c   : > { %v828_v27 = vpop.f32.mrf.mxu2  ;;  %v868_v28 = vpop.f32.mrf.mxu3 }
 0x19d   : > { %v919_v29 = vadd.f32 %v828_v27, %v366_v23  ;;  %v935_v30 = vadd.f32 %v868_v28, %v382_v24  ;;  %v750_v31 = vpop.f32.mrf.mxu0  ;;  %v790_v32 = vpop.f32.mrf.mxu1 }
 0x19e   : > { %v888_v33 = vadd.f32 %v750_v31, %v335_v25  ;;  %v904_v34 = vadd.f32 %v790_v32, %v351_v26 }
 0x19f   : > { %983 = vst [vmem:[#allocation2 + $0x1d8] sm:$0xff] %v919_v29 }
 0x1a0   : > { %999 = vst [vmem:[#allocation2 + $0x58] sm:$0xff] %v935_v30 }
 0x1a1   : > { %952 = vst [vmem:[#allocation2 + $0x60] sm:$0xff] %v888_v33 }
 0x1a2   : > { %968 = vst [vmem:[#allocation2 + $0x8] sm:$0xff] %v904_v34 }
 0x1a4   : > { %v830_v37 = vpop.f32.mrf.mxu2  ;;  %v870_v38 = vpop.f32.mrf.mxu3  ;;  %1004 = sbr.rel (%p1566_p1) target bundleno = 463 (0x1cf), region = 48 }
 0x1a5   : > { %v920_v39 = vadd.f32 %v830_v37, %v367_v35  ;;  %v936_v40 = vadd.f32 %v870_v38, %v383_v36 }
 0x1a7   : > { %984 = vst [vmem:[#allocation2 + $0xd0] sm:$0xff] %v920_v39 }
 0x1a8   : > { %1000 = vst [vmem:[#allocation2 + $0xa0] sm:$0xff] %v936_v40 }
 0x1a9   : > { %v1005_v41 = vld [vmem:[#allocation2 + $0xb0] sm:$0xff]  ;;  %v2518_v43 = vld [vmem:[%s2687_s2] ss:$0 sm:$0xff]  ;;  %v1007_v44 = vld [vmem:[#allocation2 + $0xd8] sm:$0xff] }
 0x1aa   : > { %v1006_v42 = vld [vmem:[#allocation2 + $0x1b0] sm:$0xff]  ;;  %v1008_v45 = vld [vmem:[#allocation2 + $0x18] sm:$0xff]  ;;  %v1010_v47 = vld [vmem:[#allocation2 + $0x168] sm:$0xff]  ;;  %v1073_v49 = vadd.f32 %v2518_v43, %v1005_v41  ;;  %v1075_v51 = vadd.f32 %v2518_v43, %v1007_v44 }
 0x1ab   : > { %v1009_v46 = vld [vmem:[#allocation2 + $0x50] sm:$0xff]  ;;  %v1074_v50 = vadd.f32 %v2518_v43, %v1006_v42  ;;  %v1076_v52 = vadd.f32 %v2518_v43, %v1008_v45  ;;  %v1012_v53 = vld [vmem:[#allocation2 + $0x48] sm:$0xff]  ;;  %v1013_v54 = vld [vmem:[#allocation2 + $0x180] sm:$0xff]  ;;  %v1078_v57 = vadd.f32 %v2518_v43, %v1010_v47 }
 0x1ac   : > { %v1011_v48 = vld [vmem:[#allocation2 + $0x130] sm:$0xff]  ;;  %v1077_v56 = vadd.f32 %v2518_v43, %v1009_v46  ;;  %v1080_v59 = vadd.f32 %v2518_v43, %v1012_v53  ;;  %v1015_v60 = vld [vmem:[#allocation2 + $0x118] sm:$0xff]  ;;  %v1017_v62 = vld [vmem:[#allocation2 + $0x120] sm:$0xff]  ;;  %v1081_v1 = vadd.f32 %v2518_v43, %v1013_v54 }
 0x1ad   : > { %v1014_v55 = vld [vmem:[#allocation2 + $0x110] sm:$0xff]  ;;  %v1079_v58 = vadd.f32 %v2518_v43, %v1011_v48  ;;  %v1016_v61 = vld [vmem:[#allocation2 + $0x98] sm:$0xff]  ;;  %v1617_v63 = vpack.c.bf16 %v1074_v50, %v1073_v49  ;;  %v1622_v0 = vpack.c.bf16 %v1076_v52, %v1075_v51  ;;  %v1019_v4 = vld [vmem:[#allocation2 + $0x108] sm:$0xff]  ;;  %v1083_v8 = vadd.f32 %v2518_v43, %v1015_v60 }
 0x1ae   : > { %v1082_v2 = vadd.f32 %v2518_v43, %v1014_v55  ;;  %v1018_v3 = vld [vmem:[#allocation2 + $0x150] sm:$0xff]  ;;  %v1020_v5 = vld [vmem:[#allocation2 + $0x60] sm:$0xff]  ;;  %v1627_v6 = vpack.c.bf16 %v1078_v57, %v1077_v56  ;;  %v1084_v9 = vadd.f32 %v2518_v43, %v1016_v61  ;;  %v1022_v11 = vld [vmem:[#allocation2 + $0x188] sm:$0xff]  ;;  %v1085_v14 = vadd.f32 %v2518_v43, %v1017_v62 }
 0x1af   : > { %v1632_v7 = vpack.c.bf16 %v1080_v59, %v1079_v58  ;;  %v1021_v10 = vld [vmem:[#allocation2 + $0xe0] sm:$0xff]  ;;  %v1023_v12 = vld [vmem:[#allocation2 + $0x138] sm:$0xff]  ;;  %1618 = vst [vmem:[%s2407_s7] sm:$0xff] %v1617_v63   ;;  %v1086_v15 = vadd.f32 %v2518_v43, %v1018_v3  ;;  %v1087_v16 = vadd.f32 %v2518_v43, %v1019_v4  ;;  %v1026_v19 = vld [vmem:[#allocation2 + $0x1a8] sm:$0xff]  ;;  %v1088_v21 = vadd.f32 %v2518_v43, %v1020_v5 }
 0x1b0   : > { %v1637_v13 = vpack.c.bf16 %v1082_v2, %v1081_v1  ;;  %v1024_v17 = vld [vmem:[#allocation2 + $0x140] sm:$0xff]  ;;  %1774 = vst [vmem:[%s2407_s7 + $0x8] sm:$0xff] %v1622_v0   ;;  %v1642_v20 = vpack.c.bf16 %v1084_v9, %v1083_v8  ;;  %v1089_v22 = vadd.f32 %v2518_v43, %v1021_v10  ;;  %v1090_v23 = vadd.f32 %v2518_v43, %v1022_v11  ;;  %v1027_v24 = vld [vmem:[#allocation2 + $0x1b8] sm:$0xff]  ;;  %v1028_v25 = vld [vmem:[#allocation2 + $0x28] sm:$0xff] }
 0x1b1   : > { %v1025_v18 = vld [vmem:[#allocation2 + $0x80] sm:$0xff]  ;;  %v1029_v26 = vld [vmem:[#allocation2 + $0x1e8] sm:$0xff]  ;;  %1775 = vst [vmem:[%s2407_s7 + $0x10] sm:$0xff] %v1627_v6   ;;  %v1647_v27 = vpack.c.bf16 %v1086_v15, %v1085_v14  ;;  %v1091_v28 = vadd.f32 %v2518_v43, %v1023_v12  ;;  %v1092_v29 = vadd.f32 %v2518_v43, %v1024_v17  ;;  %v1030_v31 = vld [vmem:[#allocation2 + $0xf8] sm:$0xff]  ;;  %v1652_v34 = vpack.c.bf16 %v1088_v21, %v1087_v16 }
 0x1b2   : > { %v1093_v30 = vadd.f32 %v2518_v43, %v1025_v18  ;;  %v1031_v32 = vld [vmem:[#allocation2 + $0x160] sm:$0xff]  ;;  %v1032_v33 = vld [vmem:[#allocation2 + $0x30] sm:$0xff]  ;;  %1776 = vst [vmem:[%s2407_s7 + $0x18] sm:$0xff] %v1632_v7   ;;  %v1094_v35 = vadd.f32 %v2518_v43, %v1026_v19  ;;  %v1095_v36 = vadd.f32 %v2518_v43, %v1027_v24  ;;  %v1657_v39 = vpack.c.bf16 %v1090_v23, %v1089_v22  ;;  %v1036_v45 = vld [vmem:[#allocation2 + $0x8] sm:$0xff] }
 0x1b3   : > { %v1033_v37 = vld [vmem:[#allocation2 + $0x1e0] sm:$0xff]  ;;  %1777 = vst [vmem:[%s2407_s7 + $0x20] sm:$0xff] %v1637_v13   ;;  %v1096_v40 = vadd.f32 %v2518_v43, %v1028_v25  ;;  %v1097_v41 = vadd.f32 %v2518_v43, %v1029_v26  ;;  %v1098_v42 = vadd.f32 %v2518_v43, %v1030_v31  ;;  %v1035_v44 = vld [vmem:[#allocation2 + $0xf0] sm:$0xff]  ;;  %v1662_v46 = vpack.c.bf16 %v1092_v29, %v1091_v28  ;;  %v1037_v49 = vld [vmem:[#allocation2 + $0x148] sm:$0xff] }
 0x1b4   : > { %v1034_v38 = vld [vmem:[#allocation2] sm:$0xff]  ;;  %1778 = vst [vmem:[%s2407_s7 + $0x28] sm:$0xff] %v1642_v20   ;;  %v1099_v47 = vadd.f32 %v2518_v43, %v1031_v32  ;;  %v1100_v48 = vadd.f32 %v2518_v43, %v1032_v33  ;;  %v1038_v50 = vld [vmem:[#allocation2 + $0x1d0] sm:$0xff]  ;;  %v1667_v51 = vpack.c.bf16 %v1094_v35, %v1093_v30  ;;  %v1101_v52 = vadd.f32 %v2518_v43, %v1033_v37  ;;  %v1040_v55 = vld [vmem:[#allocation2 + $0xc8] sm:$0xff] }
 0x1b5   : > { %1779 = vst [vmem:[%s2407_s7 + $0x30] sm:$0xff] %v1647_v27   ;;  %v1102_v53 = vadd.f32 %v2518_v43, %v1034_v38  ;;  %v1039_v54 = vld [vmem:[#allocation2 + $0x100] sm:$0xff]  ;;  %v1672_v56 = vpack.c.bf16 %v1096_v40, %v1095_v36  ;;  %v1103_v57 = vadd.f32 %v2518_v43, %v1035_v44  ;;  %v1104_v58 = vadd.f32 %v2518_v43, %v1036_v45  ;;  %v1042_v60 = vld [vmem:[#allocation2 + $0x1f8] sm:$0xff]  ;;  %v1044_v1 = vld [vmem:[#allocation2 + $0x128] sm:$0xff] }
 0x1b6   : > { %1780 = vst [vmem:[%s2407_s7 + $0x38] sm:$0xff] %v1652_v34   ;;  %v1041_v59 = vld [vmem:[#allocation2 + $0x40] sm:$0xff]  ;;  %v1677_v61 = vpack.c.bf16 %v1098_v42, %v1097_v41  ;;  %v1105_v62 = vadd.f32 %v2518_v43, %v1037_v49  ;;  %v1106_v63 = vadd.f32 %v2518_v43, %v1038_v50  ;;  %v1682_v2 = vpack.c.bf16 %v1100_v48, %v1099_v47  ;;  %v1046_v6 = vld [vmem:[#allocation2 + $0x1f0] sm:$0xff]  ;;  %v1047_v10 = vld [vmem:[#allocation2 + $0xe8] sm:$0xff] }
 0x1b7   : > { %1781 = vst [vmem:[%s2407_s7 + $0x40] sm:$0xff] %v1657_v39   ;;  %v1043_v0 = vld [vmem:[#allocation2 + $0x20] sm:$0xff]  ;;  %v1107_v3 = vadd.f32 %v2518_v43, %v1039_v54  ;;  %v1108_v4 = vadd.f32 %v2518_v43, %v1040_v55  ;;  %v1687_v7 = vpack.c.bf16 %v1102_v53, %v1101_v52  ;;  %v1109_v8 = vadd.f32 %v2518_v43, %v1041_v59  ;;  %v1048_v11 = vld [vmem:[#allocation2 + $0x78] sm:$0xff]  ;;  %v1049_v15 = vld [vmem:[#allocation2 + $0x70] sm:$0xff] }
 0x1b8   : > { %1782 = vst [vmem:[%s2407_s7 + $0x48] sm:$0xff] %v1662_v46   ;;  %v1045_v5 = vld [vmem:[#allocation2 + $0x1a0] sm:$0xff]  ;;  %v1110_v9 = vadd.f32 %v2518_v43, %v1042_v60  ;;  %v1692_v12 = vpack.c.bf16 %v1104_v58, %v1103_v57  ;;  %v1111_v13 = vadd.f32 %v2518_v43, %v1043_v0  ;;  %v1112_v14 = vadd.f32 %v2518_v43, %v1044_v1  ;;  %v1050_v16 = vld [vmem:[#allocation2 + $0x90] sm:$0xff]  ;;  %v1051_v20 = vld [vmem:[#allocation2 + $0x1d8] sm:$0xff] }
 0x1b9   : > { %1783 = vst [vmem:[%s2407_s7 + $0x50] sm:$0xff] %v1667_v51   ;;  %v1697_v17 = vpack.c.bf16 %v1106_v63, %v1105_v62  ;;  %v1113_v18 = vadd.f32 %v2518_v43, %v1045_v5  ;;  %v1114_v19 = vadd.f32 %v2518_v43, %v1046_v6  ;;  %v1052_v21 = vld [vmem:[#allocation2 + $0xd0] sm:$0xff]  ;;  %v1702_v22 = vpack.c.bf16 %v1108_v4, %v1107_v3  ;;  %v1053_v25 = vld [vmem:[#allocation2 + $0xb8] sm:$0xff]  ;;  %v1054_v26 = vld [vmem:[#allocation2 + $0x88] sm:$0xff] }
 0x1ba   : > { %1784 = vst [vmem:[%s2407_s7 + $0x58] sm:$0xff] %v1672_v56   ;;  %v1115_v23 = vadd.f32 %v2518_v43, %v1047_v10  ;;  %v1116_v24 = vadd.f32 %v2518_v43, %v1048_v11  ;;  %v1707_v27 = vpack.c.bf16 %v1110_v9, %v1109_v8  ;;  %v1117_v28 = vadd.f32 %v2518_v43, %v1049_v15  ;;  %v1055_v30 = vld [vmem:[#allocation2 + $0xa8] sm:$0xff]  ;;  %v1057_v35 = vld [vmem:[#allocation2 + $0x170] sm:$0xff]  ;;  %v1058_v36 = vld [vmem:[#allocation2 + $0x178] sm:$0xff] }
 0x1bb   : > { %1785 = vst [vmem:[%s2407_s7 + $0x60] sm:$0xff] %v1677_v61   ;;  %v1118_v29 = vadd.f32 %v2518_v43, %v1050_v16  ;;  %v1056_v31 = vld [vmem:[#allocation2 + $0x1c8] sm:$0xff]  ;;  %v1712_v32 = vpack.c.bf16 %v1112_v14, %v1111_v13  ;;  %v1119_v33 = vadd.f32 %v2518_v43, %v1051_v20  ;;  %v1120_v34 = vadd.f32 %v2518_v43, %v1052_v21  ;;  %v1060_v41 = vld [vmem:[#allocation2 + $0x190] sm:$0xff]  ;;  %v1061_v46 = vld [vmem:[#allocation2 + $0x198] sm:$0xff] }
 0x1bc   : > { %1786 = vst [vmem:[%s2407_s7 + $0x68] sm:$0xff] %v1682_v2   ;;  %v1717_v37 = vpack.c.bf16 %v1114_v19, %v1113_v18  ;;  %v1121_v38 = vadd.f32 %v2518_v43, %v1053_v25  ;;  %v1122_v39 = vadd.f32 %v2518_v43, %v1054_v26  ;;  %v1059_v40 = vld [vmem:[#allocation2 + $0x68] sm:$0xff]  ;;  %v1722_v42 = vpack.c.bf16 %v1116_v24, %v1115_v23  ;;  %v1062_v47 = vld [vmem:[#allocation2 + $0x38] sm:$0xff]  ;;  %v1063_v51 = vld [vmem:[#allocation2 + $0xc0] sm:$0xff] }
 0x1bd   : > { %1787 = vst [vmem:[%s2407_s7 + $0x70] sm:$0xff] %v1687_v7   ;;  %v1123_v44 = vadd.f32 %v2518_v43, %v1055_v30  ;;  %v1124_v45 = vadd.f32 %v2518_v43, %v1056_v31  ;;  %v1727_v48 = vpack.c.bf16 %v1118_v29, %v1117_v28  ;;  %v1125_v49 = vadd.f32 %v2518_v43, %v1057_v35  ;;  %v1064_v52 = vld [vmem:[#allocation2 + $0x1c0] sm:$0xff]  ;;  %v1065_v56 = vld [vmem:[#allocation2 + $0x158] sm:$0xff]  ;;  %v1066_v57 = vld [vmem:[#allocation2 + $0x10] sm:$0xff] }
 0x1be   : > { %1788 = vst [vmem:[%s2407_s7 + $0x78] sm:$0xff] %v1692_v12   ;;  %v1126_v50 = vadd.f32 %v2518_v43, %v1058_v36  ;;  %v1732_v53 = vpack.c.bf16 %v1120_v34, %v1119_v33  ;;  %v1127_v54 = vadd.f32 %v2518_v43, %v1059_v40  ;;  %v1128_v55 = vadd.f32 %v2518_v43, %v1060_v41  ;;  %v1067_v61 = vld [vmem:[#allocation2 + $0x58] sm:$0xff]  ;;  %v1068_v62 = vld [vmem:[#allocation2 + $0xa0] sm:$0xff] }
 0x1bf   : > { %1789 = vst [vmem:[%s2407_s7 + $0x80] sm:$0xff] %v1697_v17   ;;  %v1737_v58 = vpack.c.bf16 %v1122_v39, %v1121_v38  ;;  %v1129_v59 = vadd.f32 %v2518_v43, %v1061_v46  ;;  %v1130_v60 = vadd.f32 %v2518_v43, %v1062_v47  ;;  %v1742_v63 = vpack.c.bf16 %v1124_v45, %v1123_v44 }
 0x1c0   : > { %1790 = vst [vmem:[%s2407_s7 + $0x88] sm:$0xff] %v1702_v22   ;;  %v1131_v0 = vadd.f32 %v2518_v43, %v1063_v51  ;;  %v1132_v1 = vadd.f32 %v2518_v43, %v1064_v52  ;;  %v1747_v2 = vpack.c.bf16 %v1126_v50, %v1125_v49  ;;  %v1133_v3 = vadd.f32 %v2518_v43, %v1065_v56 }
 0x1c1   : > { %1791 = vst [vmem:[%s2407_s7 + $0x90] sm:$0xff] %v1707_v27   ;;  %v1134_v4 = vadd.f32 %v2518_v43, %v1066_v57  ;;  %v1752_v5 = vpack.c.bf16 %v1128_v55, %v1127_v54  ;;  %v1135_v6 = vadd.f32 %v2518_v43, %v1067_v61  ;;  %v1136_v7 = vadd.f32 %v2518_v43, %v1068_v62 }
 0x1c2   : > { %1792 = vst [vmem:[%s2407_s7 + $0x98] sm:$0xff] %v1712_v32   ;;  %v1757_v8 = vpack.c.bf16 %v1130_v60, %v1129_v59  ;;  %v1762_v9 = vpack.c.bf16 %v1132_v1, %v1131_v0 }
 0x1c3   : > { %1793 = vst [vmem:[%s2407_s7 + $0xa0] sm:$0xff] %v1717_v37   ;;  %v1767_v10 = vpack.c.bf16 %v1134_v4, %v1133_v3  ;;  %v1772_v11 = vpack.c.bf16 %v1136_v7, %v1135_v6 }
 0x1c4   : > { %1794 = vst [vmem:[%s2407_s7 + $0xa8] sm:$0xff] %v1722_v42  }
 0x1c5   : > { %1795 = vst [vmem:[%s2407_s7 + $0xb0] sm:$0xff] %v1727_v48  }
 0x1c6   : > { %1796 = vst [vmem:[%s2407_s7 + $0xb8] sm:$0xff] %v1732_v53  }
 0x1c7   : > { %1797 = vst [vmem:[%s2407_s7 + $0xc0] sm:$0xff] %v1737_v58  }
 0x1c8   : > { %1798 = vst [vmem:[%s2407_s7 + $0xc8] sm:$0xff] %v1742_v63  }
 0x1c9   : > { %1799 = vst [vmem:[%s2407_s7 + $0xd0] sm:$0xff] %v1747_v2  }
 0x1ca   : > { %1800 = vst [vmem:[%s2407_s7 + $0xd8] sm:$0xff] %v1752_v5  }
 0x1cb   : > { %1801 = vst [vmem:[%s2407_s7 + $0xe0] sm:$0xff] %v1757_v8  }
 0x1cc   : > { %1802 = vst [vmem:[%s2407_s7 + $0xe8] sm:$0xff] %v1762_v9  }
 0x1cd   : > { %1803 = vst [vmem:[%s2407_s7 + $0xf0] sm:$0xff] %v1767_v10  }
 0x1ce   : > { %1804 = vst [vmem:[%s2407_s7 + $0xf8] sm:$0xff] %v1772_v11  }
 0x1cf PF: > { %s1613_s21 = sshll.u32 %s2166_s22, 8  ;;  %s2718_s4 = sld [smem:[#allocation19_spill]] }
 0x1d0   : > { %s1278_s5 = sshll.u32 %s2407_s7, 4  ;;  %s1266_s28 = scalar_lea.sflag [#allocation5], %s246_s9  ;;  %s1279_s5 = int_to_ptr.vmem [resolvable:$true] %s1278_s5 }
 0x1d5   : > { %s1277_s10 = scalar_lea.hbm %s2718_s4, %s1613_s21  ;;  %s2048_s22 = scalar_lea.hbm %s2718_s4, 512 }
 0x1d6   : > { %s1280_s6 = sshll.u32 %s1277_s10, 4  ;;  %s1281_s6 = int_to_ptr.hbm [resolvable:$true] %s1280_s6 }
 0x1d7   : > { %s2042_s0 = sshra.s32 %s1281_s6, 4  ;;  %s2043_s0 = int_to_ptr.hbm [resolvable:$true] %s2042_s0 }
 0x1d8   : > { %s2044_s24 = scalar_lea.hbm %s2043_s0, 256  ;;  %p2049_p9 = scmp.lt.s32.totalorder %s2043_s0, %s2718_s4 }
 0x1d9   : > { %p2045_p3 = scmp.ne.s32.totalorder %s2043_s0, %s2044_s24  ;;  %p2050_p10 = scmp.lt.s32.totalorder %s2048_s22, %s2044_s24 }
 0x1db   : > { %p2046_p4 = pnand %p2045_p3, %p2368_p5  ;;  %p2051_p11 = por %p2050_p10, %p2049_p9 }
 0x1dd   : > { %p2047_p8 = pneg %p2046_p4 }
 0x1df   : > { %p2052_p6 = pnand %p2051_p11, %p2047_p8 }
 0x1e1   : > { %2055 = shalt.err (!%p2052_p6)
}
 0x1e2   : > { %s2184_s9 = smov 64   ;;  %s2185_s7 = smov 4  }
 0x1e3   : > { %1834 = dma.vmem_to_hbm [thread:$0]  (%p2368_p5), %s1279_s5, 4096, %s1281_s6, %s1266_s28, %s2184_s9, %s2184_s9, %s2185_s7  }
 0x1e4 PF: > { %p1848_p12 = scmp.ge.s32.totalorder %s2178_s25, 2  ;;  %s1295_s29 = sand.u32 1, %s2126_s12  }
 0x1e5   : > { %s1296_s21 = scalar_lea.sflag [#allocation5], %s1295_s29 }
 0x1e6   : > { %p1844_p2 = pnand %p1848_p12, %p2374_p7 }
 0x1e8   : > { %p1845_p0 = pneg %p1844_p2 }
 0x1ea   : > { %2121 = dma.done.wait (%p1845_p0), %s1296_s21, 4096  }
 0x1eb   : > { %2123 = vsyncadd (%p1845_p0), %s1296_s21, 4294963200  ;;  %s22_s25 = sadd.s32 1, %s2178_s25   ;;  %s2720_s27 = sld [smem:[#allocation12_spill]] }
 0x1ec   : > { %p2638_p13 = scmp.ge.s32.totalorder %s22_s25, 8   ;;  %s2721_s20 = sld [smem:[#allocation17_spill]] }
 0x1ed   : > { %s2722_s21 = sld [smem:[#allocation13_spill]]  ;;  %s2727_s12 = smov %s2130_s13 }
 0x1ee   : > { %s2723_s22 = sld [smem:[#allocation14_spill]]  ;;  %s2728_s13 = smov %s2134_s14 }
 0x1ef   : > { %s2724_s23 = sld [smem:[#allocation15_spill]]  ;;  %s2729_s14 = smov %s2307_s8 }
 0x1f0   : > { %s2725_s24 = sld [smem:[#allocation16_spill]]  ;;  %s2730_s15 = smov %s2142_s16 }
 0x1f1   : > { %s2731_s16 = smov %s2146_s17  ;;  %s2732_s17 = smov %s2341_s30 }
 0x1f2   : > { %s2733_s18 = smov %s2154_s19  ;;  %s2734_s19 = smov %s2720_s27 }
 0x1f3   :  { %21 = sbr.rel (!%p2638_p13) target bundleno = 15 (0xf), region = 98 }
 0x1f8   :  { %1302 = vsyncpa [#allocation4], 1 }
 0x1f9   :  { %1304 = vsyncpa [#allocation4 + $0x1], 1 }
 0x1fa   :  { %1305 = vsyncpa [#allocation7], 1 }
 0x1fb   :  { %1307 = vsyncpa [#allocation7 + $0x1], 1 }
 0x1fc   :  { %1308 = vsyncpa [#allocation5], 1 }
 0x1fd   :  { %1310 = vsyncpa [#allocation5 + $0x1], 1 }

</bundles_post_ra>
